<compile_context>
chip_gen: v6e
topology: v6e:2x2x1
jax: 0.10.0
libtpu: 0.0.40
codegen_flags: <defaults>
</compile_context>

<pallas_src>
import jax
import jax.numpy as jnp
from jax.experimental import pallas as pl
from jax.experimental.pallas import tpu as pltpu

EPS = 1e-5  # torch.nn.BatchNorm1d default eps
_VMEM_LIMIT = 32 * 1024 * 1024  # fits scoped VMEM on v5e/v6e/v7x


def _choose_l_tile(L):
    """Largest lane-dense tile (multiple of 128) that divides L, else the full L."""
    if L % 128 == 0:
        for t in (512, 384, 256, 128):
            if L % t == 0:
                return t
    return L


def stats_kernel(x_ref, s_ref, g_ref):
    # x_ref: (Cin, tl) tile of x in NCL layout (batch dim squeezed), lanes = L.
    # s_ref: (Cin, 1)   accumulator: sum over all (n, l) positions of x.
    # g_ref: (Cin, Cin) accumulator: Gram matrix sum over all positions of x x^T.
    @pl.when(jnp.logical_and(pl.program_id(0) == 0, pl.program_id(1) == 0))
    def _():
        s_ref[...] = jnp.zeros_like(s_ref)
        g_ref[...] = jnp.zeros_like(g_ref)

    x = x_ref[...].astype(jnp.float32)
    s_ref[...] += jnp.sum(x, axis=1, keepdims=True)
    # x @ x^T without materializing a transpose: contract the lane axis of both operands.
    g_ref[...] += jax.lax.dot_general(
        x, x, dimension_numbers=(((1,), (1,)), ((), ())),
        preferred_element_type=jnp.float32)


def apply_kernel(x_ref, w_ref, b_ref, o_ref):
    # x_ref: (Cin, tl)  NCL tile, lanes = L (lane-dense).
    # w_ref: (Cout, Cin) BN-folded pointwise weight (resident, constant block).
    # b_ref: (Cout, 1)   BN-folded bias.
    # o_ref: (Cout, tl)  lane-dense output tile, natively (N, Cout, L) layout.
    y = jnp.dot(w_ref[...], x_ref[...], preferred_element_type=jnp.float32)
    o_ref[...] = jnp.maximum(y + b_ref[...], 0.0).astype(o_ref.dtype)


def resblock_forward(x_ncl, conv_w, conv_b, bn_gamma, bn_beta):
    """x_ncl: (N, Cin, L) f32.  conv_w: (Cout, Cin).  Returns (N, Cout, L)."""
    del conv_b  # exactly cancelled by BatchNorm mean-centering (output is identical)
    N, Cin, L = x_ncl.shape
    Cout = conv_w.shape[0]

    tl = _choose_l_tile(L)
    grid = (N, L // tl)
    x_spec = pl.BlockSpec((None, Cin, tl), lambda n, l: (n, 0, l))

    # ---- Pass 1: per-channel sums and Gram of x (single read of x) ----------------
    s, g = pl.pallas_call(
        stats_kernel,
        out_shape=(jax.ShapeDtypeStruct((Cin, 1), jnp.float32),
                   jax.ShapeDtypeStruct((Cin, Cin), jnp.float32)),
        grid=grid,
        in_specs=[x_spec],
        out_specs=(pl.BlockSpec((Cin, 1), lambda n, l: (0, 0)),
                   pl.BlockSpec((Cin, Cin), lambda n, l: (0, 0))),
        compiler_params=pltpu.CompilerParams(
            dimension_semantics=("arbitrary", "arbitrary"),
            vmem_limit_bytes=_VMEM_LIMIT),
    )(x_ncl)

    # ---- Tiny glue: derive BN(y) stats analytically from stats of x, fold into W ---
    m = jnp.float32(N * L)
    mean_x = s[:, 0] / m                                   # (Cin,)
    mean_y = conv_w @ mean_x                               # (Cout,)  (bias drops out)
    ey2 = jnp.einsum("oc,cd,od->o", conv_w, g / m, conv_w)  # diag(W E[x x^T] W^T)
    var_y = jnp.maximum(ey2 - mean_y * mean_y, 0.0)        # biased var, as BN training
    inv_std = jax.lax.rsqrt(var_y + EPS)
    scale = bn_gamma * inv_std                             # (Cout,)
    w_fold = (conv_w * scale[:, None]).astype(jnp.float32)  # (Cout, Cin)
    b_fold = (bn_beta - mean_y * scale).reshape(Cout, 1).astype(jnp.float32)

    # ---- Pass 2: fused matmul + folded-BN affine + ReLU (second read of x, one write) ----
    out = pl.pallas_call(
        apply_kernel,
        out_shape=jax.ShapeDtypeStruct((N, Cout, L), x_ncl.dtype),
        grid=grid,
        in_specs=[x_spec,
                  pl.BlockSpec((Cout, Cin), lambda n, l: (0, 0)),
                  pl.BlockSpec((Cout, 1), lambda n, l: (0, 0))],
        out_specs=pl.BlockSpec((None, Cout, tl), lambda n, l: (n, 0, l)),
        compiler_params=pltpu.CompilerParams(
            dimension_semantics=("parallel", "parallel"),
            vmem_limit_bytes=_VMEM_LIMIT),
    )(x_ncl, w_fold, b_fold)
    return out


def _reference(x_ncl, conv_w, conv_b, bn_gamma, bn_beta):
    """Pure-JAX replica of the PyTorch forward (Conv1d k=1 -> training-mode BN -> ReLU)."""
    y = jnp.einsum("ncl,oc->nol", x_ncl, conv_w) + conv_b[None, :, None]
    mean = jnp.mean(y, axis=(0, 2), keepdims=True)
    var = jnp.mean((y - mean) ** 2, axis=(0, 2), keepdims=True)
    yn = (y - mean) / jnp.sqrt(var + EPS)
    yn = yn * bn_gamma[None, :, None] + bn_beta[None, :, None]
    return jnp.maximum(yn, 0.0)


if __name__ == "__main__":
    # Small shapes consistent with the module: (N, Cin, L), Cout
    N, Cin, L, Cout = 2, 4, 16, 8

    key = jax.random.PRNGKey(0)
    k_x, k_w, k_b = jax.random.split(key, 3)

    x = jax.random.normal(k_x, (N, Cin, L), dtype=jnp.float32)

    # Deterministic synthetic params mirroring Conv1d / BatchNorm1d shapes & init.
    bound = 1.0 / jnp.sqrt(jnp.float32(Cin))
    conv_w = jax.random.uniform(k_w, (Cout, Cin), jnp.float32, -bound, bound)
    conv_b = jax.random.uniform(k_b, (Cout,), jnp.float32, -bound, bound)
    bn_gamma = jnp.ones((Cout,), jnp.float32)
    bn_beta = jnp.zeros((Cout,), jnp.float32)

    # TODO(synk): training-mode BatchNorm1d also updates running_mean/running_var;
    # only the forward output is produced here.
    out = resblock_forward(x, conv_w, conv_b, bn_gamma, bn_beta)
    out = jax.block_until_ready(out)

    ref = _reference(x, conv_w, conv_b, bn_gamma, bn_beta)
    assert out.shape == (N, Cout, L)
    assert jnp.allclose(out, ref, atol=1e-3, rtol=1e-3), "mismatch vs reference"

    print("KERNEL_OK")
</pallas_src>

<mosaic_0001>
module attributes {stable_mosaic.version = 11 : i64} {
  func.func @stats_kernel(%arg0: i32, %arg1: i32, %arg2: memref<1x4x16xf32, #tpu.memory_space<vmem>>, %arg3: memref<4x1xf32, #tpu.memory_space<vmem>>, %arg4: memref<4x4xf32, #tpu.memory_space<vmem>>) attributes {dimension_semantics = [#tpu.dimension_semantics<arbitrary>, #tpu.dimension_semantics<arbitrary>], iteration_bounds = array<i64: 2, 1>, scalar_prefetch = 0 : i64, scratch_operands = 0 : i64, tpu.core_type = #tpu.core_type<tc>, window_params = [{transform_indices = @transform_0, window_bounds = array<i64: 1, 4, 16>}, {pipeline_mode = #tpu.pipeline_mode<synchronous>, transform_indices = @transform_1, window_bounds = array<i64: 4, 1>}, {pipeline_mode = #tpu.pipeline_mode<synchronous>, transform_indices = @transform_2, window_bounds = array<i64: 4, 4>}]} {
    %c0_i32 = arith.constant 0 : i32
    %0 = arith.cmpi eq, %arg0, %c0_i32 : i32
    %c0_i32_0 = arith.constant 0 : i32
    %1 = arith.cmpi eq, %arg1, %c0_i32_0 : i32
    %2 = arith.andi %0, %1 : i1
    %3 = arith.extui %2 : i1 to i32
    %c0_i32_1 = arith.constant 0 : i32
    %4 = arith.cmpi ne, %3, %c0_i32_1 : i32
    scf.if %4 {
      %cst_13 = arith.constant 0.000000e+00 : f32
      %16 = vector.broadcast %cst_13 : f32 to vector<4x1xf32>
      %c0_14 = arith.constant 0 : index
      %c0_15 = arith.constant 0 : index
      %17 = vector.load %arg3[%c0_14, %c0_15] : memref<4x1xf32, #tpu.memory_space<vmem>>, vector<4x1xf32>
      tpu.vector_store %arg3[%c0_14, %c0_15], %16 {strides = array<i32>} : memref<4x1xf32, #tpu.memory_space<vmem>>, vector<4x1xf32>,
      %cst_16 = arith.constant 0.000000e+00 : f32
      %18 = vector.broadcast %cst_16 : f32 to vector<4x4xf32>
      %c0_17 = arith.constant 0 : index
      %c0_18 = arith.constant 0 : index
      %19 = vector.load %arg4[%c0_17, %c0_18] : memref<4x4xf32, #tpu.memory_space<vmem>>, vector<4x4xf32>
      tpu.vector_store %arg4[%c0_17, %c0_18], %18 {strides = array<i32>} : memref<4x4xf32, #tpu.memory_space<vmem>>, vector<4x4xf32>,
    } else {
    }
    %c0 = arith.constant 0 : index
    %c0_2 = arith.constant 0 : index
    %c0_3 = arith.constant 0 : index
    %5 = vector.load %arg2[%c0, %c0_2, %c0_3] : memref<1x4x16xf32, #tpu.memory_space<vmem>>, vector<1x4x16xf32>
    %6 = vector.shape_cast %5 : vector<1x4x16xf32> to vector<4x16xf32>
    %c0_4 = arith.constant 0 : index
    %c0_5 = arith.constant 0 : index
    %7 = vector.load %arg3[%c0_4, %c0_5] : memref<4x1xf32, #tpu.memory_space<vmem>>, vector<4x1xf32>
    %cst = arith.constant dense<0.000000e+00> : vector<4xf32>
    %8 = vector.multi_reduction <add>, %6, %cst [1] : vector<4x16xf32> to vector<4xf32>
    %9 = vector.shape_cast %8 : vector<4xf32> to vector<4x1xf32>
    %10 = arith.addf %7, %9 : vector<4x1xf32>
    %c0_6 = arith.constant 0 : index
    %c0_7 = arith.constant 0 : index
    %11 = vector.load %arg3[%c0_6, %c0_7] : memref<4x1xf32, #tpu.memory_space<vmem>>, vector<4x1xf32>
    tpu.vector_store %arg3[%c0_6, %c0_7], %10 {strides = array<i32>} : memref<4x1xf32, #tpu.memory_space<vmem>>, vector<4x1xf32>,
    %c0_8 = arith.constant 0 : index
    %c0_9 = arith.constant 0 : index
    %12 = vector.load %arg4[%c0_8, %c0_9] : memref<4x4xf32, #tpu.memory_space<vmem>>, vector<4x4xf32>
    %cst_10 = arith.constant dense<0.000000e+00> : vector<4x4xf32>
    %13 = tpu.matmul %6, %6, %cst_10 {dimension_numbers = #tpu.dot_dimension_numbers<[1], [1], [0], [0], [0, 0, 1, 0], [], []>} : vector<4x16xf32>, vector<4x16xf32>, vector<4x4xf32> -> vector<4x4xf32>
    %14 = arith.addf %12, %13 : vector<4x4xf32>
    %c0_11 = arith.constant 0 : index
    %c0_12 = arith.constant 0 : index
    %15 = vector.load %arg4[%c0_11, %c0_12] : memref<4x4xf32, #tpu.memory_space<vmem>>, vector<4x4xf32>
    tpu.vector_store %arg4[%c0_11, %c0_12], %14 {strides = array<i32>} : memref<4x4xf32, #tpu.memory_space<vmem>>, vector<4x4xf32>,
    return
  }
  func.func @transform_0(%arg0: i32, %arg1: i32) -> (i32, i32, i32) {
    %c0_i32 = arith.constant 0 : i32
    %c0_i32_0 = arith.constant 0 : i32
    return %arg0, %c0_i32, %arg1 : i32, i32, i32
  }
  func.func @transform_1(%arg0: i32, %arg1: i32) -> (i32, i32) {
    %c0_i32 = arith.constant 0 : i32
    %c0_i32_0 = arith.constant 0 : i32
    %c0_i32_1 = arith.constant 0 : i32
    return %c0_i32, %c0_i32_0 : i32, i32
  }
  func.func @transform_2(%arg0: i32, %arg1: i32) -> (i32, i32) {
    %c0_i32 = arith.constant 0 : i32
    %c0_i32_0 = arith.constant 0 : i32
    %c0_i32_1 = arith.constant 0 : i32
    return %c0_i32, %c0_i32_0 : i32, i32
  }
}

</mosaic_0001>

<bundles_post_ra>
// kernel: tpu_custom_call.1
= control target key start
LH: loop header
LB: loop body
LE: loop exit
PB: predicated region body
PF: predicated region fallthrough
CT: control target
= control target key end

     0   :  { %8 = vsyncpa [#allocation3], 0  ;;  %s669_s0 = inlined_call_operand.hbm [shape: f32[2,4,16], index: 0, kind: input, shape index: {}]   ;;  %s670_s1 = inlined_call_operand.vmem [shape: f32[4,1], index: 1, kind: output, shape index: {0}]   ;;  %s671_s2 = inlined_call_operand.hbm [shape: f32[4,4], index: 2, kind: output, shape index: {1}]  }
   0x1   :  { %10 = vsyncpa [#allocation3 + $0x1], 0 }
   0x2   :  { %11 = vsyncpa [#allocation4], 0  ;;  %s545_s9 = smov 0   ;;  %s547_s10 = smov 0  }
   0x3   :  { %s549_s11 = smov 0   ;;  %s551_s12 = smov 0  }
   0x4   :  { %s553_s13 = smov 0   ;;  %s555_s14 = smov 0  }
   0x5 LB: > { %s330_s15 = sadd.s32 4294967295, %s523_s14   ;;  %s29_s16 = sadd.s32 1, %s519_s13  ;;  %s523_s14 = sphi %s555_s14, %s17_s14   ;;  %s519_s13 = sphi %s553_s13, %s680_s13   ;;  %s515_s12 = sphi %s551_s12, %s679_s12   ;;  %s511_s11 = sphi %s549_s11, %s678_s11   ;;  %s507_s10 = sphi %s547_s10, %s677_s10   ;;  %s503_s9 = sphi %s545_s9, %s676_s9  }
   0x6   : > { %p31_p0 = scmp.ge.s32.totalorder %s29_s16, 2  ;;  %s38_s17 = sadd.s32 1, %s511_s11 }
   0x7   : > { %p45_p1 = scmp.ne.s32.totalorder %s511_s11, %s507_s10  ;;  %p46_p2 = scmp.eq.s32.totalorder %s523_s14, 0 }
   0x8   : > { %s682_s16 = smov (%p31_p0, %s29_s16), 0  ;;  %p51_p4 = scmp.ne.s32.totalorder %s507_s10, %s503_s9 }
   0x9   : > { %p581_p3 = por %p46_p2, %p45_p1  ;;  %s33_s19 = ssub.s32 %s519_s13, %s682_s16 }
   0xa   : > { %p52_p5 = scmp.eq.s32.totalorder %s330_s15, 0  ;;  %p36_p6 = scmp.eq.s32.totalorder %s33_s19, 0 }
   0xb   : > { %p362_p8 = scmp.lt.s32.totalorder %s523_s14, 2  ;;  %s117_s22 = sand.u32 1, %s511_s11  }
   0xc   : > { %p590_p7 = por %p52_p5, %p51_p4  ;;  %s334_s23 = sshll.u32 %s519_s13, 6 }
   0xd   : > { %s596_s21 = scalar_select %p36_p6, %s511_s11, %s38_s17  }
   0xe   : > { %s333_s24 = sshll.u32 %s117_s22, 2  ;;  %s127_s27 = scalar_lea.hbm %s669_s0, %s334_s23 }
   0xf   : > { %s121_s28 = scalar_lea.vmem [#allocation2], %s333_s24  ;;  %p605_p9 = pnand %p362_p8, %p581_p3 }
  0x10   : > { %s129_s29 = sshll.u32 %s121_s28, 4  ;;  %p335_p10 = scmp.ge.s32.totalorder %s523_s14, 1  ;;  %s130_s29 = int_to_ptr.vmem [resolvable:$true] %s129_s29 }
  0x11   : > { %p134_p11 = scmp.lt.s32.totalorder %s523_s14, 3  ;;  %s118_s3 = scalar_lea.sflag [#allocation3], %s117_s22 }
  0x12   : > { %p419_p12 = pneg %p605_p9  ;;  %s430_s4 = scalar_lea.vmem %s130_s29, 64 }
  0x13   : > { %p431_p13 = scmp.ne.s32.totalorder %s130_s29, %s430_s4  ;;  %s525_s5 = smov [#allocation2]  }
  0x14   : > { %s435_s6 = sshll.u32 %s525_s5, 4  ;;  %s436_s6 = int_to_ptr.vmem [resolvable:$false] %s435_s6 }
  0x15   : > { %p433_p0 = pnand %p431_p13, %p419_p12  ;;  %s437_s7 = scalar_lea.vmem %s436_s6, 128 }
  0x16   : > { %p438_p2 = scmp.lt.s32.totalorder %s130_s29, %s436_s6  ;;  %p439_p3 = scmp.lt.s32.totalorder %s437_s7, %s430_s4 }
  0x17   : > { %p434_p1 = pneg %p433_p0 }
  0x18   : > { %p440_p4 = por %p439_p3, %p438_p2 }
  0x1a   : > { %p441_p5 = pnand %p440_p4, %p434_p1 }
  0x1c   : > { %444 = shalt.err (!%p441_p5)
}
  0x1d   : > { %361 = dma.hbm_to_vmem [thread:$0]  (!%p605_p9), %s127_s27, 64, %s130_s29, %s118_s3  }
  0x1e   : > { %p135_p6 = pnand %p335_p10, %p134_p11 }
  0x1f   : > { %s140_s8 = sand.u32 (!%p135_p6), 1, %s507_s10  }
  0x20   : > { %138 = sbr.rel (%p135_p6) target bundleno = 250 (0xfa), region = 24  ;;  %s336_s9 = sshll.u32 (!%p135_p6), %s140_s8, 2 }
  0x21   : > { %s141_s17 = scalar_lea.sflag (!%p135_p6), [#allocation3], %s140_s8  ;;  %s144_s18 = scalar_lea.vmem (!%p135_p6), [#allocation2], %s336_s9 }
  0x25   : > { %494 = dma.done.wait (%p590_p7), %s141_s17, 64  }
  0x26   : > { %496 = vsyncadd (%p590_p7), %s141_s17, 4294967232  ;;  %p160_p8 = scmp.eq.s32.totalorder %s515_s12, 0 }
  0x27   : > { %vm166_vm0 = vcmask (%p160_p8), 3072   ;;  %vm168_vm1 = vcmask (%p160_p8), 27648   ;;  %v526_v0 = vmov (%p160_p8), 0.0  }
  0x28   : > { %165 = sbr.rel (!%p160_p8) target bundleno = 45 (0x2d), region = 32  ;;  %167 = vst.msk [vmem:[%s670_s1] sm:$0xf] (%p160_p8), %vm166_vm0, %v526_v0 }
  0x29   : > { %169 = vst.msk [vmem:[#allocation5] sm:$0xf] (%p160_p8), %vm168_vm1, %v526_v0 }
  0x2d PF: > { %v170_v1 = vld [vmem:[%s144_s18] sm:$0xf]  ;;  %vm180_vm2 = vcmask 130048   ;;  %vm172_vm3 = vcmask 125952   ;;  %v527_v2 = vmov 0.0   ;;  %vm528_vm4 = vmmov 0  }
  0x2e   : > { %347 = vmatprep.subr.mxu0 %v527_v2  ;;  %349 = vmatprep.mubr.msk.f32.mxu0 %vm528_vm4, %v527_v2  ;;  %v173_v3 = vsel %vm172_vm3, %v170_v1, 0.0  ;;  %vm177_vm5 = vcmask 3072   ;;  %s529_s25 = smov [#allocation5]   ;;  %vm255_vm6 = vcmask 27648   ;;  %p636_p7 = scmp.eq.s32.totalorder %s330_s15, 1 }
  0x2f   : > { %348 = vmatpush3.xpose.msk.msra.mxu0 %vm180_vm2, %v170_v1  ;;  %174 = vadd.xlane.f32.xlu0 %v173_v3  ;;  %v171_v4 = vld [vmem:[%s670_s1] sm:$0xf]  ;;  %s267_s26 = sshll.u32 %s529_s25, 4  ;;  %s268_s26 = int_to_ptr.vmem [resolvable:$true] %s267_s26 }
  0x30   : > { %v179_v7 = vld [vmem:[#allocation5] sm:$0xf]  ;;  %s445_s28 = scalar_lea.vmem %s268_s26, 64  ;;  %p452_p12 = scmp.lt.s32.totalorder %s268_s26, %s268_s26 }
  0x31   : > { %p446_p9 = scmp.ne.s32.totalorder %s268_s26, %s445_s28  ;;  %p453_p13 = scmp.lt.s32.totalorder %s445_s28, %s445_s28 }
  0x32   : > { %350 = vmatmul.mubr.msk.f32.vlgmr.msra.gmra.mxu0 %vm180_vm2, %v170_v1 }
  0x33   : > { %p447_p10 = pnand %p446_p9, %p636_p7  ;;  %p454_p0 = por %p453_p13, %p452_p12 }
  0x35   : > { %p448_p11 = pneg %p447_p10 }
  0x37   : > { %p455_p1 = pnand %p454_p0, %p448_p11 }
  0xb8   : > { %v175_v5 = vpop.xlane.xlu0 %174 }
  0xb9   : > { %v176_v6 = vadd.f32 %v175_v5, %v171_v4 }
  0xbb   : > { %178 = vst.msk [vmem:[%s670_s1] sm:$0xf] %vm177_vm5, %v176_v6 }
  0xf2   : > { %v250_v8 = vpop.f32.mrf.mxu0 }
  0xf3   : > { %v254_v9 = vadd.f32 %v250_v8, %v179_v7 }
  0xf4   : > { %v351_v10 = vpop.f32.mrf.mxu0 }
  0xf5   : > { %256 = vst.msk [vmem:[#allocation5] sm:$0xf] %vm255_vm6, %v254_v9 }
  0xf6   : > { %458 = shalt.err (!%p455_p1)
}
  0xf7   : > { %355 = dma.vmem_to_hbm [thread:$0]  (%p636_p7), %s268_s26, 64, %s671_s2, [#allocation4]  }
  0xf8   : > { %498 = dma.done.wait (%p636_p7), [#allocation4], 64  }
  0xf9   : > { %500 = vsyncadd (%p636_p7), [#allocation4], 4294967232 }
  0xfa PF: > { %s17_s14 = sadd.s32 1, %s523_s14   ;;  %s676_s9 = smov %s507_s10 }
  0xfb   : > { %p14_p2 = scmp.ge.s32.totalorder %s17_s14, 4   ;;  %s677_s10 = smov %s511_s11 }
  0xfc   : > { %s678_s11 = smov %s596_s21  ;;  %s679_s12 = smov %s519_s13 }
  0xfd   : > { %s680_s13 = smov %s682_s16  ;;  %16 = sbr.rel (!%p14_p2) target bundleno = 5 (0x5), region = 73 }
 0x102   :  { %283 = vsyncpa [#allocation3], 1 }
 0x103   :  { %285 = vsyncpa [#allocation3 + $0x1], 1 }
 0x104   :  { %286 = vsyncpa [#allocation4], 1 }
 0x105   :  { %288 = vsyncpa [#allocation4 + $0x1], 1 }

</bundles_post_ra>
